<compile_context>
chip_gen: v6e
topology: v6e:2x2x1
jax: 0.10.0
libtpu: 0.0.40
codegen_flags: <defaults>
</compile_context>

<pallas_src>
import math

import jax
import jax.numpy as jnp
from jax.experimental import pallas as pl
from jax.experimental.pallas import tpu as pltpu


def _copy_kernel(x_ref, o_ref):
    # Pure data movement: the temporal shift is expressed entirely through the
    # input BlockSpec's index_map; the body is a whole-tile copy.
    o_ref[...] = x_ref[...]


def _dense_factor(n):
    """Factor n == S * L with L a multiple of 128 (lane-dense) when possible,
    preferring a sublane extent S >= 8.  Falls back to (1, n)."""
    if n % 128 != 0:
        return 1, n
    lane_divs = [l for l in range(128, n + 1, 128) if n % l == 0]
    if not lane_divs:
        return 1, n
    good = [l for l in lane_divs if n // l >= 8]
    l = max(good) if good else max(lane_divs)
    return n // l, l


def _vmem_capacity_bytes():
    try:
        info = pltpu.get_tpu_info()
        return int(getattr(info, "vmem_capacity_bytes", 64 * 1024 * 1024))
    except Exception:
        return 64 * 1024 * 1024  # conservative (v7x per-TC) fallback


def temporal_shift(x, n_segment=5, n_div=8):
    """x: (nt, c, h, w). Returns the TSM-shifted array (same shape/dtype),
    matching TemporalShift.shift (inplace=False) semantics exactly."""
    nt, c, h, w = x.shape
    assert nt % n_segment == 0, "nt must be divisible by n_segment"
    n_batch = nt // n_segment
    fold = c // n_div

    if fold == 0:
        # fold == 0: every channel falls in the identity region.
        return x

    # Channel groups of size g: g | fold and g | c, so the region boundaries
    # (fold, 2*fold) always land on group edges and there is no remainder.
    g = math.gcd(fold, c)
    n_groups = c // g
    k_next = fold // g          # groups [0, k_next)       read segment t+1
    k_prev = (2 * fold) // g    # groups [k_next, k_prev)  read segment t-1
                                # groups [k_prev, n_groups) are identity

    hw = h * w
    sub, lanes = _dense_factor(g * hw)   # lane-dense re-split of the group slab
    x5 = x.reshape(n_batch, n_segment, n_groups, sub, lanes)

    # Generation-aware batch tile: keep 2x(in+out) double-buffering well under
    # the physical VMEM of the current chip.
    vmem_cap = _vmem_capacity_bytes()
    tile_budget = max(vmem_cap // 10, 1 << 20)
    bytes_per_batch = sub * lanes * x.dtype.itemsize
    bt = max(1, min(n_batch, tile_budget // max(bytes_per_batch, 1)))
    blk = (bt, 1, 1, sub, lanes)

    T = n_segment

    def src_map(b, t, k):
        nxt = (t + 1) % T
        prv = (t + T - 1) % T
        seg = jnp.where(k < k_next, nxt, jnp.where(k < k_prev, prv, t))
        return (b, seg, k, 0, 0)

    def dst_map(b, t, k):
        return (b, t, k, 0, 0)

    out5 = pl.pallas_call(
        _copy_kernel,
        out_shape=jax.ShapeDtypeStruct(x5.shape, x5.dtype),
        grid_spec=pltpu.PrefetchScalarGridSpec(
            num_scalar_prefetch=0,
            grid=(pl.cdiv(n_batch, bt), n_segment, n_groups),
            in_specs=[pl.BlockSpec(blk, src_map)],
            out_specs=pl.BlockSpec(blk, dst_map),
        ),
        compiler_params=pltpu.CompilerParams(
            dimension_semantics=("parallel", "parallel", "parallel"),
            vmem_limit_bytes=int(vmem_cap * 0.7)),
        cost_estimate=pl.CostEstimate(
            flops=0,
            transcendentals=0,
            bytes_accessed=2 * x.size * x.dtype.itemsize),
    )(x5)

    return out5.reshape(nt, c, h, w)


def _temporal_shift_ref(x, n_segment=5, n_div=8):
    """Pure-JAX reference matching the PyTorch module exactly (circular wrap,
    as written in the provided TemporalShift.shift)."""
    nt, c, h, w = x.shape
    n_batch = nt // n_segment
    fold = c // n_div
    x5 = x.reshape(n_batch, n_segment, c, h, w)
    out = jnp.zeros_like(x5)
    if fold > 0:
        out = out.at[:, :-1, :fold].set(x5[:, 1:, :fold])
        out = out.at[:, -1, :fold].set(x5[:, 0, :fold])
        out = out.at[:, 1:, fold:2 * fold].set(x5[:, :-1, fold:2 * fold])
        out = out.at[:, 0, fold:2 * fold].set(x5[:, -1, fold:2 * fold])
    out = out.at[:, :, 2 * fold:].set(x5[:, :, 2 * fold:])
    return out.reshape(nt, c, h, w)


if __name__ == "__main__":
    # TemporalShift(n_segment=5, n_div=8): no learnable parameters.
    n_segment, n_div = 5, 8
    n_batch, c, h, w = 2, 16, 16, 16          # nt = n_batch * n_segment = 10
    nt = n_batch * n_segment

    key = jax.random.PRNGKey(0)
    x = jax.random.normal(key, (nt, c, h, w), dtype=jnp.float32)

    out = temporal_shift(x, n_segment=n_segment, n_div=n_div)
    out = jax.block_until_ready(out)

    ref = _temporal_shift_ref(x, n_segment=n_segment, n_div=n_div)
    assert out.shape == x.shape and out.dtype == x.dtype
    assert jnp.allclose(out, ref), "Pallas kernel mismatch vs reference"

    print("KERNEL_OK")
</pallas_src>

<mosaic_0001>
module attributes {stable_mosaic.version = 11 : i64} {
  func.func @_copy_kernel(%arg0: i32, %arg1: i32, %arg2: i32, %arg3: memref<2x1x1x1x512xf32, #tpu.memory_space<vmem>>, %arg4: memref<2x1x1x1x512xf32, #tpu.memory_space<vmem>>) attributes {dimension_semantics = [#tpu.dimension_semantics<parallel>, #tpu.dimension_semantics<parallel>, #tpu.dimension_semantics<parallel>], iteration_bounds = array<i64: 1, 5, 8>, scalar_prefetch = 0 : i64, scratch_operands = 0 : i64, tpu.core_type = #tpu.core_type<tc>, window_params = [{transform_indices = @transform_0, window_bounds = array<i64: 2, 1, 1, 1, 512>}, {transform_indices = @transform_1, window_bounds = array<i64: 2, 1, 1, 1, 512>}]} {
    %c0 = arith.constant 0 : index
    %c0_0 = arith.constant 0 : index
    %c0_1 = arith.constant 0 : index
    %c0_2 = arith.constant 0 : index
    %c0_3 = arith.constant 0 : index
    %0 = vector.load %arg3[%c0, %c0_0, %c0_1, %c0_2, %c0_3] : memref<2x1x1x1x512xf32, #tpu.memory_space<vmem>>, vector<2x1x1x1x512xf32>
    %c0_4 = arith.constant 0 : index
    %c0_5 = arith.constant 0 : index
    %c0_6 = arith.constant 0 : index
    %c0_7 = arith.constant 0 : index
    %c0_8 = arith.constant 0 : index
    %1 = vector.load %arg4[%c0_4, %c0_5, %c0_6, %c0_7, %c0_8] : memref<2x1x1x1x512xf32, #tpu.memory_space<vmem>>, vector<2x1x1x1x512xf32>
    tpu.vector_store %arg4[%c0_4, %c0_5, %c0_6, %c0_7, %c0_8], %0 {strides = array<i32>} : memref<2x1x1x1x512xf32, #tpu.memory_space<vmem>>, vector<2x1x1x1x512xf32>,
    return
  }
  func.func @transform_0(%arg0: i32, %arg1: i32, %arg2: i32) -> (i32, i32, i32, i32, i32) {
    %c1_i32 = arith.constant 1 : i32
    %0 = arith.addi %arg1, %c1_i32 : i32
    %c5_i32 = arith.constant 5 : i32
    %c0_i32 = arith.constant 0 : i32
    %1 = arith.cmpi eq, %c5_i32, %c0_i32 : i32
    %c1_i32_0 = arith.constant 1 : i32
    %2 = arith.select %1, %c1_i32_0, %c5_i32 : i32
    %3 = arith.remsi %0, %2 : i32
    %c0_i32_1 = arith.constant 0 : i32
    %4 = arith.cmpi ne, %3, %c0_i32_1 : i32
    %c0_i32_2 = arith.constant 0 : i32
    %5 = arith.cmpi slt, %3, %c0_i32_2 : i32
    %c0_i32_3 = arith.constant 0 : i32
    %6 = arith.cmpi slt, %2, %c0_i32_3 : i32
    %7 = arith.xori %5, %6 : i1
    %8 = arith.andi %7, %4 : i1
    %9 = arith.addi %3, %2 : i32
    %10 = arith.select %8, %9, %3 : i32
    %c5_i32_4 = arith.constant 5 : i32
    %11 = arith.addi %arg1, %c5_i32_4 : i32
    %c1_i32_5 = arith.constant 1 : i32
    %12 = arith.subi %11, %c1_i32_5 : i32
    %c5_i32_6 = arith.constant 5 : i32
    %c0_i32_7 = arith.constant 0 : i32
    %13 = arith.cmpi eq, %c5_i32_6, %c0_i32_7 : i32
    %c1_i32_8 = arith.constant 1 : i32
    %14 = arith.select %13, %c1_i32_8, %c5_i32_6 : i32
    %15 = arith.remsi %12, %14 : i32
    %c0_i32_9 = arith.constant 0 : i32
    %16 = arith.cmpi ne, %15, %c0_i32_9 : i32
    %c0_i32_10 = arith.constant 0 : i32
    %17 = arith.cmpi slt, %15, %c0_i32_10 : i32
    %c0_i32_11 = arith.constant 0 : i32
    %18 = arith.cmpi slt, %14, %c0_i32_11 : i32
    %19 = arith.xori %17, %18 : i1
    %20 = arith.andi %19, %16 : i1
    %21 = arith.addi %15, %14 : i32
    %22 = arith.select %20, %21, %15 : i32
    %c1_i32_12 = arith.constant 1 : i32
    %23 = arith.cmpi slt, %arg2, %c1_i32_12 : i32
    %c2_i32 = arith.constant 2 : i32
    %24 = arith.cmpi slt, %arg2, %c2_i32 : i32
    %25 = arith.select %24, %22, %arg1 : i32
    %26 = arith.select %23, %10, %25 : i32
    %c0_i32_13 = arith.constant 0 : i32
    %c0_i32_14 = arith.constant 0 : i32
    %c0_i32_15 = arith.constant 0 : i32
    return %arg0, %26, %arg2, %c0_i32_13, %c0_i32_14 : i32, i32, i32, i32, i32
  }
  func.func @transform_1(%arg0: i32, %arg1: i32, %arg2: i32) -> (i32, i32, i32, i32, i32) {
    %c0_i32 = arith.constant 0 : i32
    %c0_i32_0 = arith.constant 0 : i32
    %c0_i32_1 = arith.constant 0 : i32
    return %arg0, %arg1, %arg2, %c0_i32, %c0_i32_0 : i32, i32, i32, i32, i32
  }
}

</mosaic_0001>

<bundles_post_ra>
// kernel: tpu_custom_call.1
= control target key start
LH: loop header
LB: loop body
LE: loop exit
PB: predicated region body
PF: predicated region fallthrough
CT: control target
= control target key end

     0   :  { %6 = vsyncpa [#allocation3], 0  ;;  %s991_s0 = inlined_call_operand.hbm [shape: f32[2,5,8,1,512], index: 0, kind: input, shape index: {}]   ;;  %s992_s1 = inlined_call_operand.hbm [shape: f32[2,5,8,1,512], index: 1, kind: output, shape index: {}]  }
   0x1   :  { %8 = vsyncpa [#allocation3 + $0x1], 0 }
   0x2   :  { %9 = vsyncpa [#allocation4], 0 }
   0x3   :  { %11 = vsyncpa [#allocation4 + $0x1], 0  ;;  %s741_s6 = smov 0   ;;  %s743_s7 = smov 0  }
   0x4   :  { %s745_s8 = smov 0   ;;  %s747_s9 = smov 0  }
   0x5   :  { %s749_s10 = smov 0   ;;  %s751_s11 = smov 0  }
   0x6   :  { %s753_s12 = smov 0   ;;  %s755_s13 = smov 0  }
   0x7   :  { %s757_s14 = smov 0   ;;  %s759_s15 = smov 0  }
   0x8   :  { %s761_s16 = smov 0  }
   0x9 LB: > { %s421_s17 = sadd.s32 4294967295, %s721_s16   ;;  %s422_s18 = sadd.s32 4294967294, %s721_s16   ;;  %s721_s16 = sphi %s761_s16, %s17_s16   ;;  %s717_s15 = sphi %s759_s15, %s1019_s15   ;;  %s713_s14 = sphi %s757_s14, %s1018_s14   ;;  %s709_s13 = sphi %s755_s13, %s1017_s13   ;;  %s705_s12 = sphi %s753_s12, %s1016_s12   ;;  %s701_s11 = sphi %s751_s11, %s1015_s11   ;;  %s697_s10 = sphi %s749_s10, %s1014_s10   ;;  %s693_s9 = sphi %s747_s9, %s1013_s9   ;;  %s689_s8 = sphi %s745_s8, %s1012_s8   ;;  %s685_s7 = sphi %s743_s7, %s1011_s7   ;;  %s681_s6 = sphi %s741_s6, %s1010_s6  }
   0xa   : > { %s29_s19 = sadd.s32 1, %s713_s14  ;;  %s32_s20 = sadd.s32 1, %s717_s15 }
   0xb   : > { %p30_p0 = scmp.ge.s32.totalorder %s29_s19, 8  ;;  %s42_s21 = ssub.s32 0, %s32_s20 }
   0xc   : > { %s423_s23 = smin.u32 %s42_s21, %s32_s20  ;;  %s54_s24 = sadd.s32 4, %s717_s15 }
   0xd   : > { %s1021_s19 = smov (%p30_p0, %s29_s19), 0  ;;  %565 = sdivrem.u32 %s423_s23, 5 }
   0xe   : > { %997 = sst [smem:[#allocation8_spill]] %s1021_s19  ;;  %s56_s25 = ssub.s32 0, %s54_s24 }
   0xf   : > { %s33_s22 = scalar_select %p30_p0, %s32_s20, %s717_s15 }
  0x10   : > { %s426_s26 = smin.u32 %s56_s25, %s54_s24  ;;  %p68_p2 = scmp.lt.s32.totalorder %s713_s14, 1 }
  0x11   : > { %p34_p1 = scmp.ge.s32.totalorder %s33_s22, 5  ;;  %567 = sdivrem.u32 %s426_s26, 5 }
  0x12   : > { %p69_p3 = scmp.lt.s32.totalorder %s713_s14, 2  ;;  %p100_p4 = scmp.lt.s32.totalorder %s1021_s19, 1 }
  0x13   : > { %s1023_s22 = smov (%p34_p1, %s33_s22), 0  ;;  %p101_p5 = scmp.lt.s32.totalorder %s1021_s19, 2 }
  0x14   : > { %998 = sst [smem:[#allocation9_spill]] %s1023_s22  ;;  %s72_s27 = sadd.s32 1, %s1023_s22 }
  0x15   : > { %s86_s28 = sadd.s32 4, %s1023_s22  ;;  %s74_s29 = ssub.s32 0, %s72_s27 }
  0x16   : > { %s429_s30 = smin.u32 %s74_s29, %s72_s27  ;;  %s88_s2 = ssub.s32 0, %s86_s28 }
  0x17   : > { %569 = sdivrem.u32 %s429_s30, 5  ;;  %s566_s3 = spop.drf %565 }
  0x18   : > { %s432_s4 = smin.u32 %s88_s2, %s86_s28  ;;  %p425_p6 = scmp.lt.s32.totalorder %s566_s3, 0 }
  0x19   : > { %571 = sdivrem.u32 %s432_s4, 5  ;;  %s52_s5 = sadd.s32 5, %s566_s3 }
  0x1a   : > { %s568_s20 = spop.drf %567  ;;  %s814_s21 = ssub.s32 %s713_s14, %s1021_s19 }
  0x1b   : > { %s1025_s5 = smov (!%p425_p6, %s52_s5), %s566_s3  ;;  %s111_s23 = sadd.s32 1, %s701_s11 }
  0x1c   : > { %p118_p7 = scmp.ne.s32.totalorder %s701_s11, %s697_s10  ;;  %p428_p8 = scmp.lt.s32.totalorder %s568_s20, 0 }
  0x1d   : > { %s66_s25 = sadd.s32 5, %s568_s20  ;;  %p119_p10 = scmp.eq.s32.totalorder %s721_s16, 0 }
  0x1e   : > { %s1027_s25 = smov (!%p428_p8, %s66_s25), %s568_s20  ;;  %p124_p12 = scmp.ne.s32.totalorder %s697_s10, %s693_s9 }
  0x1f   : > { %s1029_s25 = smov (!%p69_p3, %s1027_s25), %s717_s15  ;;  %p827_p11 = por %p119_p10, %p118_p7 }
  0x20   : > { %s570_s24 = spop.drf %569  ;;  %s1031_s5 = smov (!%p68_p2, %s1025_s5), %s1029_s25 }
  0x21   : > { %p431_p9 = scmp.lt.s32.totalorder %s570_s24, 0  ;;  %s84_s27 = sadd.s32 5, %s570_s24 }
  0x22   : > { %s572_s26 = spop.drf %571  ;;  %p125_p0 = scmp.eq.s32.totalorder %s421_s17, 0 }
  0x23   : > { %s1033_s27 = smov (!%p431_p9, %s84_s27), %s570_s24  ;;  %p434_p13 = scmp.lt.s32.totalorder %s572_s26, 0 }
  0x24   : > { %s98_s29 = sadd.s32 5, %s572_s26  ;;  %s135_s30 = ssub.s32 %s717_s15, %s1023_s22 }
  0x25   : > { %s1035_s29 = smov (!%p434_p13, %s98_s29), %s572_s26  ;;  %p837_p1 = por %p125_p0, %p124_p12 }
  0x26   : > { %s138_s3 = sor.u32 %s135_s30, %s814_s21  ;;  %s1037_s29 = smov (!%p101_p5, %s1035_s29), %s1023_s22 }
  0x27   : > { %s1000_s2 = scalar_select %p837_p1, 1, 0 }
  0x28   : > { %p139_p2 = scmp.eq.s32.totalorder %s138_s3, 0  ;;  %s141_s9 = sadd.s32 1, %s689_s8 }
  0x29   : > { %s1039_s27 = smov (!%p100_p4, %s1033_s27), %s1037_s29  ;;  %p151_p3 = scmp.ne.s32.totalorder %s689_s8, %s685_s7 }
  0x2a   : > { %s849_s4 = scalar_select %p139_p2, %s689_s8, %s141_s9  }
  0x2b   : > { %s105_s20 = ssub.s32 %s1031_s5, %s1039_s27  ;;  %p152_p6 = scmp.eq.s32.totalorder %s421_s17, 39 }
  0x2c   : > { %s108_s24 = sor.u32 %s814_s21, %s105_s20  ;;  %p157_p8 = scmp.ne.s32.totalorder %s685_s7, %s681_s6 }
  0x2d   : > { %p109_p7 = scmp.eq.s32.totalorder %s108_s24, 0  ;;  %p859_p9 = por %p152_p6, %p151_p3 }
  0x2e   : > { %p158_p5 = scmp.eq.s32.totalorder %s422_s18, 39  ;;  %p468_p10 = scmp.lt.s32.totalorder %s721_s16, 40 }
  0x2f   : > { %s1001_s25 = scalar_select %p859_p9, 1, 0 }
  0x30   : > { %s868_s26 = scalar_select %p109_p7, %s701_s11, %s111_s23  }
  0x31   : > { %p870_p4 = por %p158_p5, %p157_p8  ;;  %s178_s21 = sand.u32 1, %s701_s11  }
  0x32   : > { %s437_s17 = sshll.u32 %s178_s21, 3  ;;  %s444_s27 = sshll.u32 %s713_s14, 2 }
  0x33   : > { %s1002_s29 = scalar_select %p870_p4, 1, 0 }
  0x34   : > { %s445_s30 = sshll.u32 %s1031_s5, 5  ;;  %s182_s3 = scalar_lea.vmem [#allocation2], %s437_s17 }
  0x35   : > { %s226_s9 = sshll.u32 %s182_s3, 4  ;;  %s221_s20 = sadd.s32 %s445_s30, %s444_s27  ;;  %s878_s9 = int_to_ptr.vmem [resolvable:$true] %s226_s9 }
  0x36   : > { %s446_s24 = sshll.u32 %s221_s20, 4  ;;  %p882_p12 = pnand %p468_p10, %p827_p11 }
  0x37   : > { %s889_s19 = scalar_lea.hbm %s991_s0, %s446_s24  ;;  %s892_s5 = scalar_lea.sflag [#allocation3], %s178_s21 }
  0x38   : > { %s573_s17 = scalar_lea.hbm %s889_s19, 128  ;;  %p575_p2 = pneg %p882_p12 }
  0x39   : > { %p574_p0 = scmp.ne.s32.totalorder %s889_s19, %s573_s17  ;;  %s578_s30 = scalar_lea.hbm %s991_s0, 5120 }
  0x3a   : > { %p579_p6 = scmp.lt.s32.totalorder %s889_s19, %s991_s0  ;;  %p580_p7 = scmp.lt.s32.totalorder %s578_s30, %s573_s17 }
  0x3b   : > { %p576_p11 = pnand %p575_p2, %p574_p0 }
  0x3c   : > { %p581_p8 = por %p580_p7, %p579_p6 }
  0x3d   : > { %p577_p3 = pneg %p576_p11 }
  0x3f   : > { %p582_p5 = pnand %p581_p8, %p577_p3 }
  0x41   : > { %585 = shalt.err (!%p582_p5)
}
  0x42   : > { %s586_s21 = scalar_lea.vmem %s878_s9, 128  ;;  %s723_s20 = smov [#allocation2]  }
  0x43   : > { %p587_p10 = scmp.ne.s32.totalorder %s878_s9, %s586_s21  ;;  %s591_s24 = sshll.u32 %s723_s20, 4  ;;  %s592_s24 = int_to_ptr.vmem [resolvable:$false] %s591_s24 }
  0x44   : > { %s593_s23 = scalar_lea.vmem %s592_s24, 256  ;;  %p594_p11 = scmp.lt.s32.totalorder %s878_s9, %s592_s24 }
  0x45   : > { %p589_p13 = pnand %p587_p10, %p575_p2  ;;  %p595_p4 = scmp.lt.s32.totalorder %s593_s23, %s586_s21 }
  0x47   : > { %p590_p0 = pneg %p589_p13  ;;  %p596_p9 = por %p595_p4, %p594_p11 }
  0x49   : > { %p597_p1 = pnand %p596_p9, %p590_p0 }
  0x4b   : > { %600 = shalt.err (!%p597_p1)
}
  0x4c   : > { %s724_s17 = smov 2560   ;;  %s725_s28 = smov 64  }
  0x4d   : > { %s726_s27 = smov 4   ;;  %p234_p13 = scmp.lt.s32.totalorder %s721_s16, 41 }
  0x4e   : > { %463 = dma.hbm_to_vmem [thread:$0]  (!%p882_p12), %s889_s19, 128, %s878_s9, %s892_s5, %s724_s17, %s725_s28, %s726_s27  }
  0x4f   : > { %p1004_p2 = scmp.ge.s32.totalorder %s721_s16, 1 }
  0x51   : > { %p235_p3 = pnand %p1004_p2, %p234_p13 }
  0x52   : > { %s240_s30 = sand.u32 (!%p235_p3), 1, %s697_s10   ;;  %p1005_p1 = scmp.ne.s32.totalorder (!%p235_p3), %s1000_s2, 0 }
  0x53   : > { %238 = sbr.rel (%p235_p3) target bundleno = 118 (0x76), region = 24  ;;  %s448_s22 = sshll.u32 (!%p235_p3), %s240_s30, 3 }
  0x54   : > { %s241_s3 = scalar_lea.sflag (!%p235_p3), [#allocation3], %s240_s30  ;;  %s244_s21 = scalar_lea.vmem (!%p235_p3), [#allocation2], %s448_s22 }
  0x58   : > { %672 = dma.done.wait (%p1005_p1), %s241_s3, 128  }
  0x59   : > { %674 = vsyncadd (%p1005_p1), %s241_s3, 4294967168  ;;  %s260_s18 = sand.u32 1, %s685_s7   ;;  %s451_s19 = sshll.u32 %s705_s12, 2  ;;  %v299_v0 = vlaneseq  ;;  %v297_v1 = vld [vmem:[%s244_s21] sm:$0xf] }
  0x5a   : > { %s449_s9 = sshll.u32 %s260_s18, 3  ;;  %s452_s5 = sshll.u32 %s709_s13, 5  ;;  %v298_v2 = vld [vmem:[%s244_s21 + $0x4] sm:$0xf] }
  0x5b   : > { %s262_s20 = scalar_lea.vmem [#allocation5], %s449_s9  ;;  %s319_s23 = sadd.s32 %s452_s5, %s451_s19  ;;  %vm301_vm0 = vcmp.lt.s32.totalorder %v299_v0, 512 }
  0x5c   : > { %s324_s24 = sshll.u32 %s262_s20, 4  ;;  %s453_s17 = sshll.u32 %s319_s23, 4  ;;  %303 = vst.msk [vmem:[%s262_s20] sm:$0xf] %vm301_vm0, %v297_v1  ;;  %304 = vst.msk [vmem:[%s262_s20 + $0x4] sm:$0xf] %vm301_vm0, %v298_v2  ;;  %s924_s24 = int_to_ptr.vmem [resolvable:$true] %s324_s24 }
  0x5d   : > { %s929_s27 = scalar_lea.hbm %s992_s1, %s453_s17  ;;  %s931_s12 = scalar_lea.sflag [#allocation4], %s260_s18 }
  0x5e   : > { %s601_s13 = scalar_lea.vmem %s924_s24, 128  ;;  %p1006_p4 = scmp.ne.s32.totalorder %s1001_s25, 0 }
  0x5f   : > { %p602_p9 = scmp.ne.s32.totalorder %s924_s24, %s601_s13  ;;  %s727_s30 = smov [#allocation5]  }
  0x60   : > { %s605_s22 = sshll.u32 %s727_s30, 4  ;;  %s606_s22 = int_to_ptr.vmem [resolvable:$false] %s605_s22 }
  0x61   : > { %p603_p12 = pnand %p602_p9, %p1006_p4  ;;  %s607_s3 = scalar_lea.vmem %s606_s22, 256 }
  0x62   : > { %p608_p7 = scmp.lt.s32.totalorder %s924_s24, %s606_s22  ;;  %p609_p8 = scmp.lt.s32.totalorder %s607_s3, %s601_s13 }
  0x63   : > { %p604_p6 = pneg %p603_p12 }
  0x64   : > { %p610_p5 = por %p609_p8, %p608_p7 }
  0x66   : > { %p611_p10 = pnand %p610_p5, %p604_p6 }
  0x68   : > { %614 = shalt.err (!%p611_p10)
}
  0x69   : > { %s615_s21 = scalar_lea.hbm %s929_s27, 128  ;;  %s619_s9 = scalar_lea.hbm %s992_s1, 5120 }
  0x6a   : > { %p616_p0 = scmp.ne.s32.totalorder %s929_s27, %s615_s21  ;;  %p620_p2 = scmp.lt.s32.totalorder %s929_s27, %s992_s1 }
  0x6b   : > { %p621_p3 = scmp.lt.s32.totalorder %s619_s9, %s615_s21 }
  0x6c   : > { %p617_p11 = pnand %p616_p0, %p1006_p4 }
  0x6d   : > { %p622_p1 = por %p621_p3, %p620_p2 }
  0x6e   : > { %p618_p13 = pneg %p617_p11 }
  0x70   : > { %p623_p9 = pnand %p622_p1, %p618_p13 }
  0x72   : > { %626 = shalt.err (!%p623_p9)
}
  0x73   : > { %s728_s23 = smov 64   ;;  %s729_s17 = smov 2560  }
  0x74   : > { %s730_s2 = smov 4  }
  0x75   : > { %458 = dma.vmem_to_hbm [thread:$0]  (%p1006_p4), %s924_s24, 128, %s929_s27, %s931_s12, %s728_s23, %s729_s17, %s730_s2  }
  0x76 PF: > { %p469_p12 = scmp.ge.s32.totalorder %s721_s16, 2  ;;  %s339_s28 = sand.u32 1, %s681_s6  }
  0x77   : > { %p1007_p6 = scmp.ne.s32.totalorder %s1002_s29, 0  ;;  %s340_s13 = scalar_lea.sflag [#allocation4], %s339_s28 }
  0x79   : > { %p465_p7 = pnand %p469_p12, %p1007_p6 }
  0x7b   : > { %p466_p8 = pneg %p465_p7 }
  0x7d   : > { %676 = dma.done.wait (%p466_p8), %s340_s13, 128  }
  0x7e   : > { %678 = vsyncadd (%p466_p8), %s340_s13, 4294967168  ;;  %s17_s16 = sadd.s32 1, %s721_s16   ;;  %s1008_s25 = sld [smem:[#allocation8_spill]] }
  0x7f   : > { %p14_p5 = scmp.ge.s32.totalorder %s17_s16, 42   ;;  %s1009_s24 = sld [smem:[#allocation9_spill]] }
  0x80   : > { %s1010_s6 = smov %s685_s7  ;;  %s1011_s7 = smov %s689_s8 }
  0x81   : > { %s1012_s8 = smov %s849_s4  ;;  %s1013_s9 = smov %s697_s10 }
  0x82   : > { %s1014_s10 = smov %s701_s11  ;;  %s1015_s11 = smov %s868_s26 }
  0x83   : > { %s1016_s12 = smov %s713_s14  ;;  %s1017_s13 = smov %s717_s15 }
  0x84   : > { %s1018_s14 = smov %s1008_s25  ;;  %16 = sbr.rel (!%p14_p5) target bundleno = 9 (0x9), region = 69 }
  0x85   : > { %s1019_s15 = smov %s1009_s24 }
  0x89   :  { %345 = vsyncpa [#allocation3], 1 }
  0x8a   :  { %347 = vsyncpa [#allocation3 + $0x1], 1 }
  0x8b   :  { %348 = vsyncpa [#allocation4], 1 }
  0x8c   :  { %350 = vsyncpa [#allocation4 + $0x1], 1 }

</bundles_post_ra>
